<compile_context>
chip_gen: v7x
topology: tpu7x:2x2x1
jax: 0.10.0
libtpu: 0.0.40
codegen_flags: <defaults>
</compile_context>

<pallas_src>
import functools
import numpy as np
import jax
import jax.numpy as jnp
from jax import lax
from jax.experimental import pallas as pl
from jax.experimental.pallas import tpu as pltpu


# ---------------------------------------------------------------------------
# Pallas kernels
# ---------------------------------------------------------------------------
def _round_up(x, m):
    return ((x + m - 1) // m) * m


def _matmul_bias_act_kernel(w_ref, x_ref, b_ref, o_ref, *, act):
    # w: (N_pad, K_pad) bf16, x: (K_pad, TM) bf16, b: (N_pad, 1) f32
    acc = jnp.dot(w_ref[...], x_ref[...], preferred_element_type=jnp.float32)
    acc = acc + b_ref[...]
    if act:  # LeakyReLU(0.1) fused
        acc = jnp.where(acc >= 0.0, acc, 0.1 * acc)
    o_ref[...] = acc


def pallas_matmul_bias(wm, x, b, act):
    """out(N, M) = wm(N, K) @ x(K, M) + b with optional fused LeakyReLU.

    Transposed formulation so the lane axis of the output is M (padded to a
    multiple of 128) -> lane-dense stores.  Operands cast to bf16, f32 accum.
    """
    N, K = wm.shape
    _, M = x.shape
    N_pad = _round_up(N, 8)
    K_pad = _round_up(K, 128)
    M128 = _round_up(M, 128)
    TM = min(512, M128)
    M_pad = _round_up(M128, TM)

    wm_p = jnp.pad(wm, ((0, N_pad - N), (0, K_pad - K))).astype(jnp.bfloat16)
    x_p = jnp.pad(x, ((0, K_pad - K), (0, M_pad - M))).astype(jnp.bfloat16)
    b_p = jnp.pad(b, (0, N_pad - N)).reshape(N_pad, 1).astype(jnp.float32)

    out = pl.pallas_call(
        functools.partial(_matmul_bias_act_kernel, act=act),
        out_shape=jax.ShapeDtypeStruct((N_pad, M_pad), jnp.float32),
        grid=(M_pad // TM,),
        in_specs=[
            pl.BlockSpec((N_pad, K_pad), lambda i: (0, 0)),   # weight (resident)
            pl.BlockSpec((K_pad, TM), lambda i: (0, i)),      # activations
            pl.BlockSpec((N_pad, 1), lambda i: (0, 0)),       # bias (resident)
        ],
        out_specs=pl.BlockSpec((N_pad, TM), lambda i: (0, i)),
        compiler_params=pltpu.CompilerParams(
            dimension_semantics=("parallel",),
            vmem_limit_bytes=32 * 1024 * 1024),
    )(wm_p, x_p, b_p)
    return out[:N, :M]


def _corr_kernel(f1_ref, f2_ref, o_ref, *, md, H, W, act):
    # f1: (1, C, H, W), f2: (1, C, H+2md, W+2md) zero padded,
    # out: (1, (2md+1)^2, H, W)   -- NCHW throughout, no transposes.
    f1 = f1_ref[0]                      # (C, H, W)
    f2 = f2_ref[0]                      # (C, Hp, Wp)
    C = f1_ref.shape[1]
    inv_c = 1.0 / float(C)
    D = 2 * md + 1
    for dy in range(D):
        for dx in range(D):
            # channel reduction over the LEADING axis -> plain VPU adds.
            v = jnp.sum(f1 * f2[:, dy:dy + H, dx:dx + W], axis=0) * inv_c
            if act:
                v = jnp.where(v >= 0.0, v, 0.1 * v)
            o_ref[0, dy * D + dx] = v


def correlation(f1, f2, stride=1, md=3, act=True):
    """Cost volume with +-md displacements (49 channels), channel-mean dot
    product, fused LeakyReLU(0.1).  intStride=2 correlates the stride-2
    subsampled grids (half-res output)."""
    # TODO(synk): FunctionCorrelation is an external CUDA op; semantics assumed
    # to be the standard FlowNet cost volume normalised by channel count.
    if stride > 1:
        f1 = f1[:, :, ::stride, ::stride]
        f2 = f2[:, :, ::stride, ::stride]
    B, C, H, W = f1.shape
    f2p = jnp.pad(f2, ((0, 0), (0, 0), (md, md), (md, md)))
    D = (2 * md + 1) ** 2
    # TODO(synk): at production resolutions add a row-tile grid axis with a
    # 2*md halo on the f2 block to bound VMEM (v7x 64 MiB).
    return pl.pallas_call(
        functools.partial(_corr_kernel, md=md, H=H, W=W, act=act),
        out_shape=jax.ShapeDtypeStruct((B, D, H, W), jnp.float32),
        grid=(B,),
        in_specs=[
            pl.BlockSpec((1, C, H, W), lambda b: (b, 0, 0, 0)),
            pl.BlockSpec((1, C, H + 2 * md, W + 2 * md), lambda b: (b, 0, 0, 0)),
        ],
        out_specs=pl.BlockSpec((1, D, H, W), lambda b: (b, 0, 0, 0)),
        compiler_params=pltpu.CompilerParams(
            dimension_semantics=("parallel",),
            vmem_limit_bytes=32 * 1024 * 1024),
    )(f1, f2p)


# ---------------------------------------------------------------------------
# Conv / warp / resize helpers (glue around the Pallas kernels)
# ---------------------------------------------------------------------------
def im2col_nchw(x, kh, kw, stride, ph, pw):
    B, C, H, W = x.shape
    xp = jnp.pad(x, ((0, 0), (0, 0), (ph, ph), (pw, pw)))
    Ho = (H + 2 * ph - kh) // stride + 1
    Wo = (W + 2 * pw - kw) // stride + 1
    cols = []
    for i in range(kh):
        for j in range(kw):
            cols.append(xp[:, :, i:i + stride * (Ho - 1) + 1:stride,
                           j:j + stride * (Wo - 1) + 1:stride])
    patches = jnp.stack(cols, axis=2)                # (B,C,kh*kw,Ho,Wo)
    return patches.reshape(B, C * kh * kw, Ho, Wo), Ho, Wo


def conv2d(x, w, b, stride=1, padding=0, act=False):
    # TODO(synk): im2col is still materialized in HBM; fusing it into the
    # Pallas kernel via a halo BlockSpec is the remaining structural win.
    O, C, kh, kw = w.shape
    if isinstance(padding, int):
        ph = pw = padding
    else:
        ph, pw = padding
    B = x.shape[0]
    if kh == 1 and kw == 1 and stride == 1 and ph == 0 and pw == 0:
        H, W = x.shape[2], x.shape[3]
        X = jnp.transpose(x.reshape(B, C, H * W), (1, 0, 2)).reshape(C, B * H * W)
        Y = pallas_matmul_bias(w.reshape(O, C), X, b, act)        # (O, B*H*W)
        return jnp.transpose(Y.reshape(O, B, H, W), (1, 0, 2, 3))
    patches, Ho, Wo = im2col_nchw(x, kh, kw, stride, ph, pw)      # (B,K,Ho,Wo)
    K = C * kh * kw
    X = jnp.transpose(patches.reshape(B, K, Ho * Wo), (1, 0, 2)).reshape(K, B * Ho * Wo)
    Y = pallas_matmul_bias(w.reshape(O, K), X, b, act)            # (O, B*Ho*Wo)
    return jnp.transpose(Y.reshape(O, B, Ho, Wo), (1, 0, 2, 3))


def apply_conv(x, p, stride=1, padding=0, act=False):
    return conv2d(x, p['w'], p['b'], stride=stride, padding=padding, act=act)


def conv_transpose_grouped(x, w):
    """ConvTranspose2d(C,C,k=4,s=2,p=1,groups=C,bias=False).  w: (C,1,4,4)."""
    C = x.shape[1]
    wf = w[:, :, ::-1, ::-1]
    return lax.conv_general_dilated(
        x, wf, window_strides=(1, 1), padding=((2, 2), (2, 2)),
        lhs_dilation=(2, 2), rhs_dilation=(1, 1),
        dimension_numbers=('NCHW', 'OIHW', 'NCHW'), feature_group_count=C)


def grid_sample_bilinear_zeros(img, grid):
    """torch.grid_sample(mode=bilinear, padding_mode=zeros, align_corners=True)."""
    B, C, H, W = img.shape
    gx = (grid[..., 0] + 1.0) * 0.5 * (W - 1)
    gy = (grid[..., 1] + 1.0) * 0.5 * (H - 1)
    x0 = jnp.floor(gx)
    y0 = jnp.floor(gy)
    x1 = x0 + 1.0
    y1 = y0 + 1.0
    wa = (x1 - gx) * (y1 - gy)
    wb = (gx - x0) * (y1 - gy)
    wc = (x1 - gx) * (gy - y0)
    wd = (gx - x0) * (gy - y0)
    flat = img.reshape(B, C, H * W)

    def gather(xi, yi):
        valid = ((xi >= 0) & (xi <= W - 1) & (yi >= 0) & (yi <= H - 1))
        xc = jnp.clip(xi, 0, W - 1).astype(jnp.int32)
        yc = jnp.clip(yi, 0, H - 1).astype(jnp.int32)
        idx = (yc * W + xc).reshape(B, 1, -1)
        vals = jnp.take_along_axis(flat, jnp.broadcast_to(idx, (B, C, idx.shape[-1])), axis=2)
        return vals * valid.reshape(B, 1, -1).astype(vals.dtype)

    out = (gather(x0, y0) * wa.reshape(B, 1, -1) + gather(x1, y0) * wb.reshape(B, 1, -1)
           + gather(x0, y1) * wc.reshape(B, 1, -1) + gather(x1, y1) * wd.reshape(B, 1, -1))
    Ho, Wo = grid.shape[1], grid.shape[2]
    return out.reshape(B, C, Ho, Wo)


def backwarp(tensorInput, tensorFlow):
    B, _, H, W = tensorFlow.shape
    hor = jnp.broadcast_to(jnp.linspace(-1.0, 1.0, W).reshape(1, 1, 1, W), (B, 1, H, W))
    ver = jnp.broadcast_to(jnp.linspace(-1.0, 1.0, H).reshape(1, 1, H, 1), (B, 1, H, W))
    base = jnp.concatenate([hor, ver], axis=1)
    inH, inW = tensorInput.shape[2], tensorInput.shape[3]
    flow_n = jnp.concatenate([tensorFlow[:, 0:1] / ((inW - 1.0) / 2.0),
                              tensorFlow[:, 1:2] / ((inH - 1.0) / 2.0)], axis=1)
    grid = jnp.transpose(base + flow_n, (0, 2, 3, 1))
    return grid_sample_bilinear_zeros(tensorInput, grid)


def resize_bilinear(x, h, w):
    B, C = x.shape[0], x.shape[1]
    return jax.image.resize(x, (B, C, h, w), method='bilinear', antialias=False)


# ---------------------------------------------------------------------------
# Deterministic parameter construction (synthetic weights)
# ---------------------------------------------------------------------------
MEAN = [[0.411618, 0.434631, 0.454253], [0.410782, 0.433645, 0.452793]]
SCALEFACTOR = [40.0 / (2.0 ** l) for l in range(7)]
FEAT_CH = {1: 32, 2: 32, 3: 64, 4: 96, 5: 128, 6: 192}
KSIZE = {1: 7, 2: 7, 3: 5, 4: 5, 5: 3, 6: 3}
PADS = {1: 3, 2: 3, 3: 2, 4: 2, 5: 1, 6: 1}
DCH = {1: 49, 2: 49, 3: 25, 4: 25, 5: 9, 6: 9}
SUBIN = {1: 130, 2: 130, 3: 130, 4: 194, 5: 258, 6: 386}
REGIN = {1: 131, 2: 131, 3: 131, 4: 131, 5: 131, 6: 195}
LEVELS = [3, 4, 5, 6]          # lowest_level=3


class PGen:
    def __init__(self, seed=0):
        self.base = jax.random.PRNGKey(seed)
        self.i = 0

    def _next(self):
        self.i += 1
        return jax.random.fold_in(self.base, self.i)

    def conv(self, cin, cout, kh, kw=None):
        if kw is None:
            kw = kh
        fan_in = cin * kh * kw
        w = jax.random.normal(self._next(), (cout, cin, kh, kw), jnp.float32) / np.sqrt(fan_in)
        b = 0.01 * jax.random.normal(self._next(), (cout,), jnp.float32)
        return {'w': w, 'b': b}

    def deconv(self, ch):
        w = 0.25 * jax.random.normal(self._next(), (ch, 1, 4, 4), jnp.float32)
        return {'w': w}


def build_params():
    g = PGen(0)
    P = {'netc': {
        'conv1': [g.conv(3, 32, 7)],
        'conv2': [g.conv(32, 32, 3), g.conv(32, 32, 3), g.conv(32, 32, 3)],
        'conv3': [g.conv(32, 64, 3), g.conv(64, 64, 3)],
        'conv4': [g.conv(64, 96, 3), g.conv(96, 96, 3)],
        'conv5': [g.conv(96, 128, 3)],
        'conv6': [g.conv(128, 192, 3)],
    }, 'levels': {}}
    for L in LEVELS:
        k = KSIZE[L]
        lv = {
            'upConv_M': g.deconv(2) if L != 6 else None,
            'upCorr_M': g.deconv(49) if L < 4 else None,
            'conv_M': [g.conv(49, 128, 3), g.conv(128, 128, 3), g.conv(128, 96, 3),
                       g.conv(96, 64, 3), g.conv(64, 32, 3), g.conv(32, 2, k)],
            'conv_S': [g.conv(SUBIN[L], 128, 3), g.conv(128, 128, 3), g.conv(128, 96, 3),
                       g.conv(96, 64, 3), g.conv(64, 32, 3), g.conv(32, 2, k)],
            'moduleFeat': g.conv(FEAT_CH[L], 128, 1) if L < 5 else None,
            'conv_R': [g.conv(REGIN[L], 128, 3), g.conv(128, 128, 3), g.conv(128, 64, 3),
                       g.conv(64, 64, 3), g.conv(64, 32, 3), g.conv(32, 32, 3)],
            'scaleX': g.conv(DCH[L], 1, 1),
            'scaleY': g.conv(DCH[L], 1, 1),
        }
        if L < 5:
            lv['conv_dist'] = [g.conv(32, DCH[L], k, 1), g.conv(DCH[L], DCH[L], 1, k)]
        else:
            lv['conv_dist'] = [g.conv(32, DCH[L], k)]
        P['levels'][L] = lv
    return P


# ---------------------------------------------------------------------------
# Sub-networks
# ---------------------------------------------------------------------------
def features(P, x):
    c1 = apply_conv(x, P['conv1'][0], 1, 3, True)
    c2 = apply_conv(c1, P['conv2'][0], 2, 1, True)
    c2 = apply_conv(c2, P['conv2'][1], 1, 1, True)
    c2 = apply_conv(c2, P['conv2'][2], 1, 1, True)
    c3 = apply_conv(c2, P['conv3'][0], 2, 1, True)
    c3 = apply_conv(c3, P['conv3'][1], 1, 1, True)
    c4 = apply_conv(c3, P['conv4'][0], 2, 1, True)
    c4 = apply_conv(c4, P['conv4'][1], 1, 1, True)
    c5 = apply_conv(c4, P['conv5'][0], 2, 1, True)
    c6 = apply_conv(c5, P['conv6'][0], 2, 1, True)
    return [c1, c2, c3, c4, c5, c6]


def conv_head(x, layers, last_pad):
    n = len(layers)
    for i, p in enumerate(layers):
        last = (i == n - 1)
        x = apply_conv(x, p, 1, last_pad if last else 1, act=not last)
    return x


def matching(lv, L, img1, img2, f1, f2, xflow):
    scale = SCALEFACTOR[L]
    if xflow is not None:
        xflow = conv_transpose_grouped(xflow, lv['upConv_M']['w'])
        f2 = backwarp(f2, xflow * scale)
    if lv['upCorr_M'] is None:
        corr = correlation(f1, f2, stride=1)                       # leaky fused
    else:
        corr = conv_transpose_grouped(correlation(f1, f2, stride=2),
                                      lv['upCorr_M']['w'])
    flow_M = conv_head(corr, lv['conv_M'], PADS[L])
    return flow_M + (xflow if xflow is not None else 0.0)


def subpixel(lv, L, img1, img2, f1, f2, xflow):
    scale = SCALEFACTOR[L]
    if xflow is not None:
        f2 = backwarp(f2, xflow * scale)
    x = jnp.concatenate([f1, f2, xflow], axis=1)
    flow_S = conv_head(x, lv['conv_S'], PADS[L])
    return flow_S + (xflow if xflow is not None else 0.0)


def regularization(lv, L, img1, img2, f1, f2, xflow_S):
    scale = SCALEFACTOR[L]
    B = xflow_S.shape[0]
    mean_flow = xflow_S.reshape(B, 2, -1).mean(axis=2).reshape(B, 2, 1, 1)
    rm_flow = xflow_S - mean_flow
    warp = backwarp(img2, xflow_S * scale)
    norm_R = jnp.sqrt(jnp.sum((img1 - warp) ** 2, axis=1, keepdims=True))
    featR = apply_conv(f1, lv['moduleFeat'], 1, 0, True) if lv['moduleFeat'] is not None else f1
    y = jnp.concatenate([norm_R, rm_flow, featR], axis=1)
    for p in lv['conv_R']:
        y = apply_conv(y, p, 1, 1, True)
    k, pd = KSIZE[L], PADS[L]
    if L < 5:
        y = apply_conv(y, lv['conv_dist'][0], 1, (pd, 0), False)
        y = apply_conv(y, lv['conv_dist'][1], 1, (0, pd), False)
    else:
        y = apply_conv(y, lv['conv_dist'][0], 1, (pd, pd), False)
    negsq = -(y ** 2)
    dist = jnp.exp(negsq - jnp.max(negsq, axis=1, keepdims=True))
    divisor = 1.0 / jnp.sum(dist, axis=1, keepdims=True)
    unf_x, _, _ = im2col_nchw(xflow_S[:, 0:1], k, k, 1, pd, pd)   # (B,k*k,H,W)
    unf_y, _, _ = im2col_nchw(xflow_S[:, 1:2], k, k, 1, pd, pd)
    # Merge scaleX + scaleY into a single N=2 block-diagonal 1x1 matmul.
    Dch = dist.shape[1]
    H, W = dist.shape[2], dist.shape[3]
    Xcat = jnp.concatenate([dist * unf_x, dist * unf_y], axis=1)  # (B,2D,H,W)
    X = jnp.transpose(Xcat.reshape(B, 2 * Dch, H * W), (1, 0, 2)).reshape(2 * Dch, B * H * W)
    wx = lv['scaleX']['w'].reshape(1, Dch)
    wy = lv['scaleY']['w'].reshape(1, Dch)
    zeros = jnp.zeros((1, Dch), jnp.float32)
    Wblk = jnp.concatenate([jnp.concatenate([wx, zeros], axis=1),
                            jnp.concatenate([zeros, wy], axis=1)], axis=0)   # (2, 2D)
    bxy = jnp.concatenate([lv['scaleX']['b'], lv['scaleY']['b']])
    Y = pallas_matmul_bias(Wblk, X, bxy, act=False)               # (2, B*H*W)
    sxy = jnp.transpose(Y.reshape(2, B, H, W), (1, 0, 2, 3)) * divisor
    return sxy


def liteflownet2_forward(P, img1, img2, training=False):
    img1 = img1 - jnp.array(MEAN[0], jnp.float32).reshape(1, 3, 1, 1)
    img2 = img2 - jnp.array(MEAN[1], jnp.float32).reshape(1, 3, 1, 1)
    im_shape = (img1.shape[2], img1.shape[3])
    feat1 = features(P['netc'], img1)
    feat2 = features(P['netc'], img2)
    imgs1, imgs2 = [img1], [img2]
    for lvl in range(1, 6):
        h, w = feat1[lvl].shape[2], feat1[lvl].shape[3]
        imgs1.append(resize_bilinear(imgs1[-1], h, w))
        imgs2.append(resize_bilinear(imgs2[-1], h, w))
    xflow = None
    xflow_train = []
    for L in reversed(LEVELS):          # 6, 5, 4, 3
        idx = L - 1
        lv = P['levels'][L]
        f1, f2 = feat1[idx], feat2[idx]
        i1, i2 = imgs1[idx], imgs2[idx]
        xflow_M = matching(lv, L, i1, i2, f1, f2, xflow)
        xflow_S = subpixel(lv, L, i1, i2, f1, f2, xflow_M)
        xflow = regularization(lv, L, i1, i2, f1, f2, xflow_S)
        xflow_train.append([xflow_M, xflow_S, xflow])
    if training:
        xflow_train.append([resize_bilinear(xflow, im_shape[0], im_shape[1])])
        return xflow_train
    return xflow * SCALEFACTOR[1]


# ---------------------------------------------------------------------------
if __name__ == "__main__":
    key = jax.random.PRNGKey(0)
    k1, k2 = jax.random.split(key)
    # smallest spatial size compatible with the 6-level pyramid (level 6 -> 2x2)
    img1 = jax.random.uniform(k1, (1, 3, 64, 64), jnp.float32)
    img2 = jax.random.uniform(k2, (1, 3, 64, 64), jnp.float32)
    params = build_params()
    flow = liteflownet2_forward(params, img1, img2, training=False)
    flow = jax.block_until_ready(flow)
    assert flow.shape == (1, 2, 16, 16), flow.shape
    assert bool(jnp.all(jnp.isfinite(flow)))
    print("KERNEL_OK")
</pallas_src>

<mosaic_0001>
module attributes {stable_mosaic.version = 11 : i64} {
  func.func @_matmul_bias_act_kernel(%arg0: i32, %arg1: memref<32x256xbf16, #tpu.memory_space<vmem>>, %arg2: memref<256x512xbf16, #tpu.memory_space<vmem>>, %arg3: memref<32x1xf32, #tpu.memory_space<vmem>>, %arg4: memref<32x512xf32, #tpu.memory_space<vmem>>) attributes {dimension_semantics = [#tpu.dimension_semantics<parallel>], iteration_bounds = array<i64: 8>, scalar_prefetch = 0 : i64, scratch_operands = 0 : i64, tpu.core_type = #tpu.core_type<tc>, window_params = [{pipeline_mode = #tpu.pipeline_mode<synchronous>, transform_indices = @transform_0, window_bounds = array<i64: 32, 256>}, {transform_indices = @transform_1, window_bounds = array<i64: 256, 512>}, {pipeline_mode = #tpu.pipeline_mode<synchronous>, transform_indices = @transform_2, window_bounds = array<i64: 32, 1>}, {transform_indices = @transform_3, window_bounds = array<i64: 32, 512>}]} {
    %c0 = arith.constant 0 : index
    %c0_0 = arith.constant 0 : index
    %0 = vector.load %arg1[%c0, %c0_0] : memref<32x256xbf16, #tpu.memory_space<vmem>>, vector<32x256xbf16>
    %c0_1 = arith.constant 0 : index
    %c0_2 = arith.constant 0 : index
    %1 = vector.load %arg2[%c0_1, %c0_2] : memref<256x512xbf16, #tpu.memory_space<vmem>>, vector<256x512xbf16>
    %cst = arith.constant dense<0.000000e+00> : vector<32x512xf32>
    %2 = tpu.matmul %0, %1, %cst {dimension_numbers = #tpu.dot_dimension_numbers<[1], [0], [0], [1], [0, 0, 1, 1], [], []>} : vector<32x256xbf16>, vector<256x512xbf16>, vector<32x512xf32> -> vector<32x512xf32>
    %c0_3 = arith.constant 0 : index
    %c0_4 = arith.constant 0 : index
    %3 = vector.load %arg3[%c0_3, %c0_4] : memref<32x1xf32, #tpu.memory_space<vmem>>, vector<32x1xf32>
    %4 = vector.broadcast %3 : vector<32x1xf32> to vector<32x512xf32>
    %5 = arith.addf %2, %4 : vector<32x512xf32>
    %cst_5 = arith.constant 0.000000e+00 : f32
    %6 = vector.broadcast %cst_5 : f32 to vector<32x512xf32>
    %7 = arith.cmpf oge, %5, %6 : vector<32x512xf32>
    %cst_6 = arith.constant 1.000000e-01 : f32
    %8 = vector.broadcast %cst_6 : f32 to vector<32x512xf32>
    %9 = arith.mulf %8, %5 : vector<32x512xf32>
    %10 = arith.select %7, %5, %9 : vector<32x512xi1>, vector<32x512xf32>
    %c0_7 = arith.constant 0 : index
    %c0_8 = arith.constant 0 : index
    %11 = vector.load %arg4[%c0_7, %c0_8] : memref<32x512xf32, #tpu.memory_space<vmem>>, vector<32x512xf32>
    tpu.vector_store %arg4[%c0_7, %c0_8], %10 {strides = array<i32>} : memref<32x512xf32, #tpu.memory_space<vmem>>, vector<32x512xf32>,
    return
  }
  func.func @transform_0(%arg0: i32) -> (i32, i32) {
    %c0_i32 = arith.constant 0 : i32
    %c0_i32_0 = arith.constant 0 : i32
    %c0_i32_1 = arith.constant 0 : i32
    return %c0_i32, %c0_i32_0 : i32, i32
  }
  func.func @transform_1(%arg0: i32) -> (i32, i32) {
    %c0_i32 = arith.constant 0 : i32
    %c0_i32_0 = arith.constant 0 : i32
    return %c0_i32, %arg0 : i32, i32
  }
  func.func @transform_2(%arg0: i32) -> (i32, i32) {
    %c0_i32 = arith.constant 0 : i32
    %c0_i32_0 = arith.constant 0 : i32
    %c0_i32_1 = arith.constant 0 : i32
    return %c0_i32, %c0_i32_0 : i32, i32
  }
  func.func @transform_3(%arg0: i32) -> (i32, i32) {
    %c0_i32 = arith.constant 0 : i32
    %c0_i32_0 = arith.constant 0 : i32
    return %c0_i32, %arg0 : i32, i32
  }
}

</mosaic_0001>

<bundles_post_ra>
// kernel: tpu_custom_call.1
= control target key start
LH: loop header
LB: loop body
LE: loop exit
PB: predicated region body
PF: predicated region fallthrough
CT: control target
= control target key end

     0   :  { %8 = vsyncpa [#allocation3], 0  ;;  %s1621_s0 = inlined_call_operand.hbm [shape: bf16[32,256], index: 0, kind: input, shape index: {}]   ;;  %s1622_s1 = inlined_call_operand.hbm [shape: bf16[256,4096], index: 1, kind: input, shape index: {}]   ;;  %s1623_s2 = inlined_call_operand.vmem [shape: f32[32,1], index: 2, kind: input, shape index: {}]   ;;  %s1624_s3 = inlined_call_operand.hbm [shape: f32[32,4096], index: 3, kind: output, shape index: {}]  }
   0x1   :  { %9 = vsyncpa [#allocation6], 0 }
   0x2   :  { %11 = vsyncpa [#allocation6 + $0x1], 0 }
   0x3   :  { %12 = vsyncpa [#allocation4], 0 }
   0x4   :  { %14 = vsyncpa [#allocation4 + $0x1], 0  ;;  %s1325_s12 = smov 0   ;;  %s1327_s13 = smov 0  }
   0x5   :  { %s1329_s14 = smov 0   ;;  %s1331_s15 = smov 0  }
   0x6 LB: > { %s1346_s16 = sadd.s32 4294967295, %s1291_s15   ;;  %s907_s17 = sadd.s32 4294967294, %s1291_s15   ;;  %s1291_s15 = sphi %s1331_s15, %s1647_s15   ;;  %s1287_s14 = sphi %s1329_s14, %s1646_s14   ;;  %s1283_s13 = sphi %s1327_s13, %s1645_s13   ;;  %s1279_s12 = sphi %s1325_s12, %s1644_s12  }
   0x7   : > { %s1350_s18 = sadd.s32 1, %s1291_s15   ;;  %s48_s19 = sadd.s32 1, %s1287_s14 }
   0x8   : > { %s45_s20 = ssub.s32 %s1291_s15, %s1350_s18  ;;  %p55_p0 = scmp.ne.s32.totalorder %s1287_s14, %s1283_s13 }
   0x9   : > { %p46_p1 = scmp.eq.s32.totalorder %s45_s20, 0  ;;  %p56_p2 = scmp.eq.s32.totalorder %s1291_s15, 0 }
   0xa   : > { %p61_p3 = scmp.ne.s32.totalorder %s1283_s13, %s1279_s12  ;;  %p1625_p4 = scmp.eq.s32.totalorder %s1346_s16, 0 }
   0xb   : > { %s1362_s21 = scalar_select %p46_p1, %s1287_s14, %s48_s19  }
   0xc   : > { %p1364_p5 = por %p56_p2, %p55_p0  ;;  %p1370_p6 = por %p1625_p4, %p61_p3 }
   0xd   : > { %p106_p7 = scmp.eq.s32.totalorder %s1346_s16, 7  ;;  %p112_p8 = scmp.eq.s32.totalorder %s907_s17, 7 }
   0xe   : > { %s1629_s22 = scalar_select %p1364_p5, 1, 0 }
   0xf   : > { %s1630_s23 = scalar_select %p1370_p6, 1, 0 }
  0x10   : > { %p908_p9 = scmp.ge.s32.totalorder %s1291_s15, 1  ;;  %p119_p10 = scmp.lt.s32.totalorder %s1291_s15, 9 }
  0x11   : > { %p1377_p11 = por %p106_p7, %p55_p0  ;;  %p1381_p12 = por %p112_p8, %p61_p3 }
  0x12   : > { %p1385_p13 = pnand %p908_p9, %p119_p10  ;;  %s1293_s27 = smov [#allocation2]  }
  0x13   : > { %s1631_s24 = scalar_select %p1377_p11, 1, 0 }
  0x14   : > { %s1632_s25 = scalar_select %p1381_p12, 1, 0 }
  0x15   : > { %s1633_s26 = scalar_select %p1385_p13, 1, 0 }
  0x16   : > { %p1001_p1 = pneg %p1385_p13  ;;  %s131_s28 = sshll.u32 %s1293_s27, 4  ;;  %s132_s28 = int_to_ptr.vmem [resolvable:$true] %s131_s28 }
  0x17   : > { %s148_s30 = sand.u32 1, %s1287_s14   ;;  %s1163_s6 = scalar_lea.hbm %s1621_s0, 512 }
  0x18   : > { %p1393_p2 = pnand %p1001_p1, %p1625_p4  ;;  %p1164_p3 = scmp.ne.s32.totalorder %s1621_s0, %s1163_s6 }
  0x19   : > { %p1170_p10 = scmp.lt.u32.totalorder %s1163_s6, %s1621_s0 }
  0x1a   : > { %p1165_p7 = pneg %p1393_p2 }
  0x1c   : > { %p1166_p8 = pnand %p1165_p7, %p1164_p3 }
  0x1e   : > { %p1167_p9 = pneg %p1166_p8 }
  0x20   : > { %p1172_p1 = pnand %p1170_p10, %p1167_p9 }
  0x22   : > { %1175 = shalt.err (!%p1172_p1)
}
  0x23   : > { %s1176_s11 = scalar_lea.vmem %s132_s28, 512  ;;  %p1184_p11 = scmp.lt.s32.totalorder %s132_s28, %s132_s28 }
  0x24   : > { %p1177_p4 = scmp.ne.s32.totalorder %s132_s28, %s1176_s11  ;;  %p1185_p6 = scmp.lt.s32.totalorder %s1176_s11, %s1176_s11 }
  0x26   : > { %p1179_p0 = pnand %p1177_p4, %p1165_p7  ;;  %p1186_p13 = por %p1185_p6, %p1184_p11 }
  0x28   : > { %p1180_p12 = pneg %p1179_p0 }
  0x2a   : > { %p1187_p5 = pnand %p1186_p13, %p1180_p12 }
  0x2c   : > { %1190 = shalt.err (!%p1187_p5)
}
  0x2d   : > { %s1294_s17 = smov 128   ;;  %s1295_s19 = smov 8  }
  0x2e   : > { %1004 = dma.hbm_to_vmem [thread:$0]  (!%p1393_p2), %s1621_s0, 512, %s132_s28, [#allocation3], %s1294_s17, %s1294_s17, %s1295_s19  }
  0x2f   : > { %p1635_p3 = scmp.ne.s32.totalorder %s1629_s22, 0  ;;  %p1636_p8 = scmp.lt.s32.totalorder %s1291_s15, 8 }
  0x30   : > { %s911_s5 = sshll.u32 %s148_s30, 9  ;;  %s991_s6 = sshll.u32 %s1291_s15, 8 }
  0x31   : > { %p1419_p4 = pnand %p1636_p8, %p1635_p3  ;;  %s1427_s9 = scalar_lea.hbm %s1622_s1, %s991_s6 }
  0x32   : > { %s152_s28 = scalar_lea.vmem [#allocation5], %s911_s5  ;;  %s1431_s29 = scalar_lea.sflag [#allocation6], %s148_s30 }
  0x33   : > { %s159_s22 = sshll.u32 %s152_s28, 4  ;;  %s1191_s10 = scalar_lea.hbm %s1427_s9, 8192  ;;  %s1429_s22 = int_to_ptr.vmem [resolvable:$true] %s159_s22 }
  0x34   : > { %p1192_p5 = scmp.ne.s32.totalorder %s1427_s9, %s1191_s10  ;;  %p1193_p6 = pneg %p1419_p4 }
  0x35   : > { %s1196_s19 = scalar_lea.hbm %s1622_s1, 65536  ;;  %p1197_p13 = scmp.lt.u32.totalorder %s1427_s9, %s1622_s1 }
  0x36   : > { %p1194_p11 = pnand %p1193_p6, %p1192_p5  ;;  %p1198_p2 = scmp.lt.u32.totalorder %s1196_s19, %s1191_s10 }
  0x37   : > { %p1200_p7 = scmp.lt.u32.totalorder %s1191_s10, %s1427_s9 }
  0x38   : > { %p1195_p12 = pneg %p1194_p11  ;;  %p1199_p0 = por %p1198_p2, %p1197_p13 }
  0x3a   : > { %p1201_p9 = por %p1200_p7, %p1199_p0 }
  0x3c   : > { %p1202_p10 = pnand %p1201_p9, %p1195_p12 }
  0x3e   : > { %1205 = shalt.err (!%p1202_p10)
}
  0x3f   : > { %s1206_s30 = scalar_lea.vmem %s1429_s22, 8192  ;;  %s1296_s5 = smov [#allocation5]  }
  0x40   : > { %p1207_p1 = scmp.ne.s32.totalorder %s1429_s22, %s1206_s30  ;;  %s1211_s6 = sshll.u32 %s1296_s5, 4  ;;  %s1212_s6 = int_to_ptr.vmem [resolvable:$false] %s1211_s6 }
  0x41   : > { %s1213_s7 = scalar_lea.vmem %s1212_s6, 16384  ;;  %p1214_p5 = scmp.lt.s32.totalorder %s1429_s22, %s1212_s6 }
  0x42   : > { %p1209_p3 = pnand %p1207_p1, %p1193_p6  ;;  %p1215_p11 = scmp.lt.s32.totalorder %s1213_s7, %s1206_s30 }
  0x44   : > { %p1210_p8 = pneg %p1209_p3  ;;  %p1216_p13 = por %p1215_p11, %p1214_p5 }
  0x46   : > { %p1217_p2 = pnand %p1216_p13, %p1210_p8 }
  0x48   : > { %1220 = shalt.err (!%p1217_p2)
}
  0x49   : > { %s1297_s8 = smov 2048   ;;  %s1298_s28 = smov 256  }
  0x4a   : > { %s1299_s10 = smov 16   ;;  %p1638_p6 = scmp.ne.s32.totalorder %s1633_s26, 0 }
  0x4b   : > { %1008 = dma.hbm_to_vmem [thread:$0]  (!%p1419_p4), %s1427_s9, 8192, %s1429_s22, %s1431_s29, %s1297_s8, %s1298_s28, %s1299_s10  }
  0x4c   : > { %171 = sbr.rel (%p1638_p6) target bundleno = 401 (0x191), region = 32  ;;  %p1639_p12 = scmp.eq.s32.totalorder (!%p1638_p6), %s1346_s16, 0 }
  0x53   : > { %1266 = dma.done.wait (%p1639_p12), [#allocation3], 512   ;;  %p1640_p0 = pmov %p1639_p12 }
  0x54   : > { %s1466_s11 = sand.u32 1, %s1283_s13   ;;  %p1641_p4 = scmp.ne.s32.totalorder %s1630_s23, 0 }
  0x55   : > { %1268 = vsyncadd (%p1640_p0), [#allocation3], 4294966784  ;;  %s916_s17 = sshll.u32 %s1466_s11, 9  ;;  %s178_s19 = scalar_lea.sflag [#allocation6], %s1466_s11 }
  0x56   : > { %s1470_s20 = scalar_lea.vmem [#allocation5], %s916_s17 }
  0x57   : > { %1270 = dma.done.wait (%p1641_p4), %s178_s19, 8192  }
  0x58   : > { %1272 = vsyncadd (%p1641_p4), %s178_s19, 4294959104  ;;  %v1300_v0 = vmov 0   ;;  %v1061_v1 = vld [vmem:[%s1470_s20 + $0x4] ss:$16 sps:$4 sm:$0xff]   ;;  %v1063_v2 = vld [vmem:[%s1470_s20 + $0xc] ss:$16 sps:$4 sm:$0xff]  }
  0x59   : > { %1059 = vset.pattern.permute.xlu0 %v1300_v0  ;;  %1060 = vset.pattern.permute.xlu1 %v1300_v0  ;;  %v1065_v3 = vld [vmem:[%s1470_s20] ss:$16 sps:$4 sm:$0xff]   ;;  %v1066_v4 = vld [vmem:[%s1470_s20 + $0x8] ss:$16 sps:$4 sm:$0xff]   ;;  %v1067_v5 = vld [vmem:[%s1470_s20 + $0x24] ss:$16 sps:$4 sm:$0xff]  }
  0x5a   : > { %638 = vmatprep.subr.bf16.mxu0 %v1061_v1  ;;  %691 = vmatprep.subr.bf16.mxu1 %v1063_v2  ;;  %v1069_v6 = vld [vmem:[%s1470_s20 + $0x2c] ss:$16 sps:$4 sm:$0xff]   ;;  %v1071_v7 = vld [vmem:[%s1470_s20 + $0x20] ss:$16 sps:$4 sm:$0xff]   ;;  %v1072_v8 = vld [vmem:[%s1470_s20 + $0x28] ss:$16 sps:$4 sm:$0xff]  }
  0x5b   : > { %639 = vmatpush1.bf16.msra.mxu0 %v1065_v3  ;;  %692 = vmatpush1.bf16.msra.mxu1 %v1066_v4  ;;  %v1073_v9 = vld [vmem:[%s1470_s20 + $0x44] ss:$16 sps:$4 sm:$0xff]   ;;  %v1075_v10 = vld [vmem:[%s1470_s20 + $0x4c] ss:$16 sps:$4 sm:$0xff]   ;;  %v1077_v11 = vld [vmem:[%s1470_s20 + $0x40] ss:$16 sps:$4 sm:$0xff]  }
  0x5c   : > { %640 = vmatprep.subr.bf16.mxu0 %v1067_v5  ;;  %693 = vmatprep.subr.bf16.mxu1 %v1069_v6  ;;  %v1078_v12 = vld [vmem:[%s1470_s20 + $0x48] ss:$16 sps:$4 sm:$0xff]   ;;  %v1079_v13 = vld [vmem:[%s1470_s20 + $0x64] ss:$16 sps:$4 sm:$0xff]   ;;  %v1081_v14 = vld [vmem:[%s1470_s20 + $0x6c] ss:$16 sps:$4 sm:$0xff]  }
  0x5d   : > { %v1083_v15 = vld [vmem:[%s1470_s20 + $0x60] ss:$16 sps:$4 sm:$0xff]   ;;  %v1084_v16 = vld [vmem:[%s1470_s20 + $0x68] ss:$16 sps:$4 sm:$0xff]   ;;  %v1085_v17 = vld [vmem:[%s1470_s20 + $0x84] ss:$16 sps:$4 sm:$0xff]  }
  0x5e   : > { %v1087_v18 = vld [vmem:[%s1470_s20 + $0x8c] ss:$16 sps:$4 sm:$0xff]   ;;  %v1089_v19 = vld [vmem:[%s1470_s20 + $0x80] ss:$16 sps:$4 sm:$0xff]   ;;  %v1090_v20 = vld [vmem:[%s1470_s20 + $0x88] ss:$16 sps:$4 sm:$0xff]  }
  0x5f   : > { %641 = vmatpush1.bf16.msra.mxu0 %v1071_v7  ;;  %694 = vmatpush1.bf16.msra.mxu1 %v1072_v8  ;;  %v1091_v21 = vld [vmem:[%s1470_s20 + $0xa4] ss:$16 sps:$4 sm:$0xff]   ;;  %v1093_v22 = vld [vmem:[%s1470_s20 + $0xac] ss:$16 sps:$4 sm:$0xff]   ;;  %v1095_v23 = vld [vmem:[%s1470_s20 + $0xa0] ss:$16 sps:$4 sm:$0xff]  }
  0x60   : > { %642 = vmatprep.subr.bf16.mxu0 %v1073_v9  ;;  %695 = vmatprep.subr.bf16.mxu1 %v1075_v10  ;;  %v1096_v24 = vld [vmem:[%s1470_s20 + $0xa8] ss:$16 sps:$4 sm:$0xff]   ;;  %v1097_v25 = vld [vmem:[%s1470_s20 + $0xc4] ss:$16 sps:$4 sm:$0xff]   ;;  %v1099_v26 = vld [vmem:[%s1470_s20 + $0xcc] ss:$16 sps:$4 sm:$0xff]  }
  0x61   : > { %v1101_v27 = vld [vmem:[%s1470_s20 + $0xc0] ss:$16 sps:$4 sm:$0xff]   ;;  %v1102_v28 = vld [vmem:[%s1470_s20 + $0xc8] ss:$16 sps:$4 sm:$0xff]   ;;  %v1103_v29 = vld [vmem:[%s1470_s20 + $0xe4] ss:$16 sps:$4 sm:$0xff]  }
  0x62   : > { %v1105_v30 = vld [vmem:[%s1470_s20 + $0xec] ss:$16 sps:$4 sm:$0xff]   ;;  %v1107_v31 = vld [vmem:[%s1470_s20 + $0xe0] ss:$16 sps:$4 sm:$0xff]   ;;  %v1108_v32 = vld [vmem:[%s1470_s20 + $0xe8] ss:$16 sps:$4 sm:$0xff]  }
  0x63   : > { %643 = vmatpush1.bf16.msra.mxu0 %v1077_v11  ;;  %696 = vmatpush1.bf16.msra.mxu1 %v1078_v12  ;;  %v1109_v33 = vld [vmem:[%s1470_s20 + $0x104] ss:$16 sps:$4 sm:$0xff]   ;;  %v1111_v34 = vld [vmem:[%s1470_s20 + $0x10c] ss:$16 sps:$4 sm:$0xff]   ;;  %v1113_v35 = vld [vmem:[%s1470_s20 + $0x100] ss:$16 sps:$4 sm:$0xff]  }
  0x64   : > { %644 = vmatprep.subr.bf16.mxu0 %v1079_v13  ;;  %697 = vmatprep.subr.bf16.mxu1 %v1081_v14  ;;  %v1114_v36 = vld [vmem:[%s1470_s20 + $0x108] ss:$16 sps:$4 sm:$0xff]   ;;  %v1115_v37 = vld [vmem:[%s1470_s20 + $0x124] ss:$16 sps:$4 sm:$0xff]   ;;  %v1117_v38 = vld [vmem:[%s1470_s20 + $0x12c] ss:$16 sps:$4 sm:$0xff]  }
  0x65   : > { %v1119_v39 = vld [vmem:[%s1470_s20 + $0x120] ss:$16 sps:$4 sm:$0xff]   ;;  %v1120_v40 = vld [vmem:[%s1470_s20 + $0x128] ss:$16 sps:$4 sm:$0xff]   ;;  %v1121_v41 = vld [vmem:[%s1470_s20 + $0x144] ss:$16 sps:$4 sm:$0xff]  }
  0x66   : > { %v1123_v42 = vld [vmem:[%s1470_s20 + $0x14c] ss:$16 sps:$4 sm:$0xff]   ;;  %v1125_v43 = vld [vmem:[%s1470_s20 + $0x140] ss:$16 sps:$4 sm:$0xff]   ;;  %v1126_v44 = vld [vmem:[%s1470_s20 + $0x148] ss:$16 sps:$4 sm:$0xff]  }
  0x67   : > { %645 = vmatpush1.bf16.msra.mxu0 %v1083_v15  ;;  %698 = vmatpush1.bf16.msra.mxu1 %v1084_v16  ;;  %v1127_v45 = vld [vmem:[%s1470_s20 + $0x164] ss:$16 sps:$4 sm:$0xff]   ;;  %v1129_v46 = vld [vmem:[%s1470_s20 + $0x16c] ss:$16 sps:$4 sm:$0xff]   ;;  %v1131_v47 = vld [vmem:[%s1470_s20 + $0x160] ss:$16 sps:$4 sm:$0xff]  }
  0x68   : > { %646 = vmatprep.subr.bf16.mxu0 %v1085_v17  ;;  %699 = vmatprep.subr.bf16.mxu1 %v1087_v18  ;;  %v1159_v48 = vld [vmem:[#allocation2 + $0x4] ss:$8 sps:$4 sm:$0xff]   ;;  %v1132_v49 = vld [vmem:[%s1470_s20 + $0x168] ss:$16 sps:$4 sm:$0xff]   ;;  %v276_v53 = vld [vmem:[%s1623_s2 + $0x10] sm:$0xff]  ;;  %s917_s5 = sshll.u32 %s1466_s11, 7 }
  0x69   : > { %v1133_v50 = vld [vmem:[%s1470_s20 + $0x184] ss:$16 sps:$4 sm:$0xff]   ;;  %v1135_v51 = vld [vmem:[%s1470_s20 + $0x18c] ss:$16 sps:$4 sm:$0xff]   ;;  %670 = vmatprep.mubr.bf16.mxu0 %v1159_v48  ;;  %723 = vmatprep.mubr.bf16.mxu1 %v1159_v48  ;;  %v1137_v54 = vld [vmem:[%s1470_s20 + $0x180] ss:$16 sps:$4 sm:$0xff]  }
  0x6a   : > { %v274_v52 = vld [vmem:[%s1623_s2] sm:$0xff]  ;;  %290 = vperm.xlu1 %1060, %v276_v53   ;;  %v1138_v55 = vld [vmem:[%s1470_s20 + $0x188] ss:$16 sps:$4 sm:$0xff]   ;;  %v1141_v59 = vld [vmem:[%s1470_s20 + $0x1ac] ss:$16 sps:$4 sm:$0xff]   ;;  %s1553_s6 = scalar_lea.vmem [#allocation7], %s917_s5 }
  0x6b   : > { %647 = vmatpush1.bf16.msra.mxu0 %v1089_v19  ;;  %700 = vmatpush1.bf16.msra.mxu1 %v1090_v20  ;;  %v275_v56 = vld [vmem:[%s1623_s2 + $0x8] sm:$0xff]  ;;  %v277_v57 = vld [vmem:[%s1623_s2 + $0x18] sm:$0xff]  ;;  %v1139_v58 = vld [vmem:[%s1470_s20 + $0x1a4] ss:$16 sps:$4 sm:$0xff]   ;;  %s992_s7 = sshll.u32 %s1346_s16, 9  ;;  %s822_s8 = sshll.u32 %s1553_s6, 4  ;;  %s1574_s8 = int_to_ptr.vmem [resolvable:$true] %s822_s8 }
  0x6c   : > { %648 = vmatprep.subr.bf16.mxu0 %v1091_v21  ;;  %701 = vmatprep.subr.bf16.mxu1 %v1093_v22  ;;  %v1143_v60 = vld [vmem:[%s1470_s20 + $0x1a0] ss:$16 sps:$4 sm:$0xff]   ;;  %v1144_v61 = vld [vmem:[%s1470_s20 + $0x1a8] ss:$16 sps:$4 sm:$0xff]   ;;  %v1145_v62 = vld [vmem:[%s1470_s20 + $0x1c4] ss:$16 sps:$4 sm:$0xff]   ;;  %s1572_s10 = scalar_lea.hbm %s1624_s3, %s992_s7 }
  0x6d   : > { %280 = vperm.xlu0 %1059, %v274_v52   ;;  %v1147_v63 = vld [vmem:[%s1470_s20 + $0x1cc] ss:$16 sps:$4 sm:$0xff]   ;;  %v1149_v0 = vld [vmem:[%s1470_s20 + $0x1c0] ss:$16 sps:$4 sm:$0xff]   ;;  %v1150_v1 = vld [vmem:[%s1470_s20 + $0x1c8] ss:$16 sps:$4 sm:$0xff]  }
  0x6e   : > { %295 = vperm.xlu1 %1060, %v277_v57   ;;  %v1151_v2 = vld [vmem:[%s1470_s20 + $0x1e4] ss:$16 sps:$4 sm:$0xff]   ;;  %v1153_v3 = vld [vmem:[%s1470_s20 + $0x1ec] ss:$16 sps:$4 sm:$0xff]   ;;  %v1155_v4 = vld [vmem:[%s1470_s20 + $0x1e0] ss:$16 sps:$4 sm:$0xff]  }
  0x6f   : > { %649 = vmatpush1.bf16.msra.mxu0 %v1095_v23  ;;  %702 = vmatpush1.bf16.msra.mxu1 %v1096_v24  ;;  %v1156_v5 = vld [vmem:[%s1470_s20 + $0x1e8] ss:$16 sps:$4 sm:$0xff]   ;;  %v1160_v7 = vld [vmem:[#allocation2 + $0x14] ss:$8 sps:$4 sm:$0xff]   ;;  %s809_s17 = scalar_lea.sflag [#allocation4], %s1466_s11  ;;  %s1221_s19 = scalar_lea.vmem %s1574_s8, 2048 }
  0x70   : > { %650 = vmatprep.subr.bf16.mxu0 %v1097_v25  ;;  %703 = vmatprep.subr.bf16.mxu1 %v1099_v26  ;;  %v1157_v6 = vld [vmem:[#allocation2] ss:$8 sps:$4 sm:$0xff]   ;;  %v1162_v8 = vld [vmem:[#allocation2 + $0x10] ss:$8 sps:$4 sm:$0xff]   ;;  %p1222_p7 = scmp.ne.s32.totalorder %s1574_s8, %s1221_s19  ;;  %p1642_p9 = scmp.ne.s32.totalorder %s1631_s24, 0 }
  0x71   : > { %285 = vperm.xlu0 %1059, %v275_v56   ;;  %s1301_s20 = smov [#allocation7]  }
  0x72   : > { %p1223_p10 = pnand %p1222_p7, %p1642_p9  ;;  %s1225_s23 = sshll.u32 %s1301_s20, 4  ;;  %s1226_s23 = int_to_ptr.vmem [resolvable:$false] %s1225_s23 }
  0x73   : > { %651 = vmatpush1.bf16.msra.mxu0 %v1101_v27  ;;  %704 = vmatpush1.bf16.msra.mxu1 %v1102_v28  ;;  %s1227_s26 = scalar_lea.vmem %s1226_s23, 4096  ;;  %p1228_p3 = scmp.lt.s32.totalorder %s1574_s8, %s1226_s23 }
  0x74   : > { %652 = vmatprep.subr.bf16.mxu0 %v1103_v29  ;;  %705 = vmatprep.subr.bf16.mxu1 %v1105_v30  ;;  %p1224_p1 = pneg %p1223_p10  ;;  %p1229_p8 = scmp.lt.s32.totalorder %s1227_s26, %s1221_s19 }
  0x76   : > { %p1230_p5 = por %p1229_p8, %p1228_p3 }
  0x77   : > { %653 = vmatpush1.bf16.msra.mxu0 %v1107_v31  ;;  %706 = vmatpush1.bf16.msra.mxu1 %v1108_v32 }
  0x78   : > { %654 = vmatprep.subr.bf16.mxu0 %v1109_v33  ;;  %707 = vmatprep.subr.bf16.mxu1 %v1111_v34  ;;  %p1231_p11 = pnand %p1230_p5, %p1224_p1 }
  0x7b   : > { %655 = vmatpush1.bf16.msra.mxu0 %v1113_v35  ;;  %708 = vmatpush1.bf16.msra.mxu1 %v1114_v36 }
  0x7c   : > { %656 = vmatprep.subr.bf16.mxu0 %v1115_v37  ;;  %709 = vmatprep.subr.bf16.mxu1 %v1117_v38 }
  0x7f   : > { %657 = vmatpush1.bf16.msra.mxu0 %v1119_v39  ;;  %710 = vmatpush1.bf16.msra.mxu1 %v1120_v40 }
  0x80   : > { %658 = vmatprep.subr.bf16.mxu0 %v1121_v41  ;;  %711 = vmatprep.subr.bf16.mxu1 %v1123_v42 }
  0x83   : > { %659 = vmatpush1.bf16.msra.mxu0 %v1125_v43  ;;  %712 = vmatpush1.bf16.msra.mxu1 %v1126_v44 }
  0x84   : > { %660 = vmatprep.subr.bf16.mxu0 %v1127_v45  ;;  %713 = vmatprep.subr.bf16.mxu1 %v1129_v46 }
  0x87   : > { %661 = vmatpush1.bf16.msra.mxu0 %v1131_v47  ;;  %714 = vmatpush1.bf16.msra.mxu1 %v1132_v49 }
  0x88   : > { %662 = vmatprep.subr.bf16.mxu0 %v1133_v50  ;;  %715 = vmatprep.subr.bf16.mxu1 %v1135_v51 }
  0x8b   : > { %663 = vmatpush1.bf16.msra.mxu0 %v1137_v54  ;;  %716 = vmatpush1.bf16.msra.mxu1 %v1138_v55 }
  0x8c   : > { %664 = vmatprep.subr.bf16.mxu0 %v1139_v58  ;;  %717 = vmatprep.subr.bf16.mxu1 %v1141_v59 }
  0x8f   : > { %665 = vmatpush1.bf16.msra.mxu0 %v1143_v60  ;;  %718 = vmatpush1.bf16.msra.mxu1 %v1144_v61 }
  0x90   : > { %666 = vmatprep.subr.bf16.mxu0 %v1145_v62  ;;  %719 = vmatprep.subr.bf16.mxu1 %v1147_v63 }
  0x93   : > { %667 = vmatpush1.bf16.msra.mxu0 %v1149_v0  ;;  %720 = vmatpush1.bf16.msra.mxu1 %v1150_v1 }
  0x94   : > { %668 = vmatprep.subr.bf16.mxu0 %v1151_v2  ;;  %721 = vmatprep.subr.bf16.mxu1 %v1153_v3 }
  0x97   : > { %669 = vmatpush1.bf16.msra.mxu0 %v1155_v4  ;;  %722 = vmatpush1.bf16.msra.mxu1 %v1156_v5 }
  0x9a   : > { %671 = vmatmul.mubr.bf16.vlgmr.msra.gmra.mrb[0].mxu0 %v1157_v6  ;;  %724 = vmatmul.mubr.bf16.vlgmr.msra.gmra.mrb[0].mxu1 %v1157_v6 }
  0x9b   : > { %680 = vmatprep.mubr.bf16.mxu0 %v1160_v7  ;;  %733 = vmatprep.mubr.bf16.mxu1 %v1160_v7 }
  0xa2   : > { %681 = vmatmul.mubr.bf16.gmra.mrb[4].mxu0 %v1162_v8  ;;  %734 = vmatmul.mubr.bf16.gmra.mrb[4].mxu1 %v1162_v8 }
  0xe9   : > { %v291_v37 = vpop.permute.xlu1 %290 }
  0xec   : > { %v281_v9 = vpop.permute.xlu0 %280 }
  0xed   : > { %v296_v56 = vpop.permute.xlu1 %295 }
  0xf0   : > { %v286_v10 = vpop.permute.xlu0 %285 }
 0x16d   : > { %v672_v11 = vpop.f32.mrb[0].mxu0  ;;  %v725_v12 = vpop.f32.mrb[0].mxu1 }
 0x16e   : > { %v673_v13 = vadd.f32 %v672_v11, %v281_v9  ;;  %v726_v14 = vadd.f32 %v725_v12, %v281_v9  ;;  %v674_v15 = vpop.f32.mrb[1].mxu0  ;;  %v727_v16 = vpop.f32.mrb[1].mxu1 }
 0x16f   : > { %v675_v17 = vadd.f32 %v674_v15, %v281_v9  ;;  %v728_v18 = vadd.f32 %v727_v16, %v281_v9  ;;  %v676_v19 = vpop.f32.mrb[2].mxu0  ;;  %v729_v20 = vpop.f32.mrb[2].mxu1 }
 0x170   : > { %vm744_vm0 = vcmp.ge.f32.partialorder %v673_v13, 0.0  ;;  %v760_v21 = vmul.f32 0.1, %v673_v13  ;;  %vm746_vm1 = vcmp.ge.f32.partialorder %v726_v14, 0.0  ;;  %v762_v22 = vmul.f32 0.1, %v726_v14 }
 0x171   : > { %vm745_vm2 = vcmp.ge.f32.partialorder %v675_v17, 0.0  ;;  %v761_v23 = vmul.f32 0.1, %v675_v17  ;;  %vm747_vm3 = vcmp.ge.f32.partialorder %v728_v18, 0.0  ;;  %v763_v24 = vmul.f32 0.1, %v728_v18 }
 0x172   : > { %v776_v25 = vsel %vm744_vm0, %v673_v13, %v760_v21  ;;  %v778_v26 = vsel %vm746_vm1, %v726_v14, %v762_v22  ;;  %v677_v27 = vadd.f32 %v676_v19, %v286_v10  ;;  %v730_v28 = vadd.f32 %v729_v20, %v286_v10  ;;  %v678_v29 = vpop.f32.mrb[3].mxu0  ;;  %v731_v30 = vpop.f32.mrb[3].mxu1 }
 0x173   : > { %792 = vst [vmem:[%s1553_s6] sm:$0xff] %v776_v25  ;;  %794 = vst [vmem:[%s1553_s6 + $0x10] sm:$0xff] %v778_v26  ;;  %v777_v31 = vsel %vm745_vm2, %v675_v17, %v761_v23  ;;  %v779_v32 = vsel %vm747_vm3, %v728_v18, %v763_v24  ;;  %v679_v33 = vadd.f32 %v678_v29, %v286_v10 }
 0x174   : > { %v732_v34 = vadd.f32 %v731_v30, %v286_v10  ;;  %793 = vst [vmem:[%s1553_s6 + $0x8] sm:$0xff] %v777_v31  ;;  %795 = vst [vmem:[%s1553_s6 + $0x18] sm:$0xff] %v779_v32  ;;  %vm748_vm4 = vcmp.ge.f32.partialorder %v677_v27, 0.0  ;;  %v764_v35 = vmul.f32 0.1, %v677_v27  ;;  %vm750_vm5 = vcmp.ge.f32.partialorder %v730_v28, 0.0 }
 0x175   : > { %v766_v36 = vmul.f32 0.1, %v730_v28  ;;  %vm749_vm6 = vcmp.ge.f32.partialorder %v679_v33, 0.0  ;;  %v765_v38 = vmul.f32 0.1, %v679_v33  ;;  %v682_v42 = vpop.f32.mrb[4].mxu0 }
 0x176   : > { %vm751_vm7 = vcmp.ge.f32.partialorder %v732_v34, 0.0  ;;  %v767_v39 = vmul.f32 0.1, %v732_v34  ;;  %v780_v40 = vsel %vm748_vm4, %v677_v27, %v764_v35  ;;  %v735_v43 = vpop.f32.mrb[4].mxu1  ;;  %v683_v46 = vadd.f32 %v682_v42, %v291_v37  ;;  %v684_v48 = vpop.f32.mrb[5].mxu0 }
 0x177   : > { %v782_v41 = vsel %vm750_vm5, %v730_v28, %v766_v36  ;;  %796 = vst [vmem:[%s1553_s6 + $0x20] sm:$0xff] %v780_v40  ;;  %v781_v44 = vsel %vm749_vm6, %v679_v33, %v765_v38  ;;  %v736_v47 = vadd.f32 %v735_v43, %v291_v37  ;;  %v737_v49 = vpop.f32.mrb[5].mxu1  ;;  %v685_v50 = vadd.f32 %v684_v48, %v291_v37  ;;  %v686_v52 = vpop.f32.mrb[6].mxu0 }
 0x178   : > { %798 = vst [vmem:[%s1553_s6 + $0x30] sm:$0xff] %v782_v41  ;;  %v783_v45 = vsel %vm751_vm7, %v732_v34, %v767_v39  ;;  %797 = vst [vmem:[%s1553_s6 + $0x28] sm:$0xff] %v781_v44  ;;  %v738_v51 = vadd.f32 %v737_v49, %v291_v37  ;;  %v739_v53 = vpop.f32.mrb[6].mxu1  ;;  %vm752_vm8 = vcmp.ge.f32.partialorder %v683_v46, 0.0  ;;  %v768_v54 = vmul.f32 0.1, %v683_v46 }
 0x179   : > { %799 = vst [vmem:[%s1553_s6 + $0x38] sm:$0xff] %v783_v45  ;;  %vm754_vm9 = vcmp.ge.f32.partialorder %v736_v47, 0.0  ;;  %v770_v55 = vmul.f32 0.1, %v736_v47  ;;  %vm753_vm10 = vcmp.ge.f32.partialorder %v685_v50, 0.0  ;;  %v687_v61 = vadd.f32 %v686_v52, %v296_v56  ;;  %v688_v63 = vpop.f32.mrb[7].mxu0 }
 0x17a   : > { %v769_v57 = vmul.f32 0.1, %v685_v50  ;;  %vm755_vm11 = vcmp.ge.f32.partialorder %v738_v51, 0.0  ;;  %v771_v58 = vmul.f32 0.1, %v738_v51  ;;  %v784_v59 = vsel %vm752_vm8, %v683_v46, %v768_v54  ;;  %v741_v0 = vpop.f32.mrb[7].mxu1 }
 0x17b   : > { %v786_v60 = vsel %vm754_vm9, %v736_v47, %v770_v55  ;;  %v740_v62 = vadd.f32 %v739_v53, %v296_v56  ;;  %800 = vst [vmem:[%s1553_s6 + $0x40] sm:$0xff] %v784_v59  ;;  %v689_v3 = vadd.f32 %v688_v63, %v296_v56  ;;  %v742_v4 = vadd.f32 %v741_v0, %v296_v56 }
 0x17c   : > { %802 = vst [vmem:[%s1553_s6 + $0x50] sm:$0xff] %v786_v60  ;;  %v785_v1 = vsel %vm753_vm10, %v685_v50, %v769_v57  ;;  %v787_v2 = vsel %vm755_vm11, %v738_v51, %v771_v58  ;;  %vm756_vm12 = vcmp.ge.f32.partialorder %v687_v61, 0.0  ;;  %v772_v5 = vmul.f32 0.1, %v687_v61 }
 0x17d   : > { %801 = vst [vmem:[%s1553_s6 + $0x48] sm:$0xff] %v785_v1  ;;  %803 = vst [vmem:[%s1553_s6 + $0x58] sm:$0xff] %v787_v2  ;;  %vm758_vm13 = vcmp.ge.f32.partialorder %v740_v62, 0.0  ;;  %v774_v6 = vmul.f32 0.1, %v740_v62  ;;  %vm757_vm14 = vcmp.ge.f32.partialorder %v689_v3, 0.0 }
 0x17e   : > { %v773_v7 = vmul.f32 0.1, %v689_v3  ;;  %vm759_vm15 = vcmp.ge.f32.partialorder %v742_v4, 0.0  ;;  %v775_v8 = vmul.f32 0.1, %v742_v4  ;;  %v788_v9 = vsel %vm756_vm12, %v687_v61, %v772_v5 }
 0x17f   : > { %v790_v10 = vsel %vm758_vm13, %v740_v62, %v774_v6  ;;  %804 = vst [vmem:[%s1553_s6 + $0x60] sm:$0xff] %v788_v9 }
 0x180   : > { %806 = vst [vmem:[%s1553_s6 + $0x70] sm:$0xff] %v790_v10  ;;  %v789_v11 = vsel %vm757_vm14, %v689_v3, %v773_v7  ;;  %v791_v12 = vsel %vm759_vm15, %v742_v4, %v775_v8 }
 0x181   : > { %805 = vst [vmem:[%s1553_s6 + $0x68] sm:$0xff] %v789_v11  ;;  %807 = vst [vmem:[%s1553_s6 + $0x78] sm:$0xff] %v791_v12 }
 0x182   : > { %1234 = shalt.err (!%p1231_p11)
}
 0x183   : > { %s1235_s4 = scalar_lea.hbm %s1572_s10, 2048  ;;  %s1239_s29 = scalar_lea.hbm %s1624_s3, 16384 }
 0x184   : > { %p1236_p13 = scmp.ne.s32.totalorder %s1572_s10, %s1235_s4  ;;  %p1240_p12 = scmp.lt.u32.totalorder %s1572_s10, %s1624_s3 }
 0x185   : > { %p1241_p0 = scmp.lt.u32.totalorder %s1239_s29, %s1235_s4  ;;  %p1243_p7 = scmp.lt.u32.totalorder %s1235_s4, %s1572_s10 }
 0x186   : > { %p1237_p2 = pnand %p1236_p13, %p1642_p9 }
 0x187   : > { %p1242_p4 = por %p1241_p0, %p1240_p12 }
 0x188   : > { %p1238_p6 = pneg %p1237_p2 }
 0x189   : > { %p1244_p10 = por %p1243_p7, %p1242_p4 }
 0x18b   : > { %p1245_p1 = pnand %p1244_p10, %p1238_p6 }
 0x18d   : > { %1248 = shalt.err (!%p1245_p1)
}
 0x18e   : > { %s1302_s5 = smov 512   ;;  %s1303_s6 = smov 4096  }
 0x18f   : > { %s1304_s7 = smov 32  }
 0x190   : > { %999 = dma.vmem_to_hbm [thread:$0]  (%p1642_p9), %s1574_s8, 2048, %s1572_s10, %s809_s17, %s1302_s5, %s1303_s6, %s1304_s7  }
 0x191 PF: > { %p1016_p3 = scmp.ge.s32.totalorder %s1291_s15, 2  ;;  %s837_s16 = sand.u32 1, %s1279_s12  }
 0x192   : > { %p1643_p8 = scmp.ne.s32.totalorder %s1632_s25, 0  ;;  %s838_s28 = scalar_lea.sflag [#allocation4], %s837_s16 }
 0x194   : > { %p1010_p5 = pnand %p1016_p3, %p1643_p8 }
 0x196   : > { %1274 = dma.done.wait (!%p1010_p5), %s838_s28, 2048  }
 0x197   : > { %1276 = vsyncadd (!%p1010_p5), %s838_s28, 4294965248  ;;  %p17_p11 = scmp.ge.s32.totalorder %s1350_s18, 10   ;;  %s1644_s12 = smov %s1283_s13 }
 0x198   : > { %s1645_s13 = smov %s1287_s14  ;;  %s1646_s14 = smov %s1362_s21 }
 0x199   : > { %s1647_s15 = smov %s1350_s18  ;;  %19 = sbr.rel (!%p17_p11) target bundleno = 6 (0x6), region = 82 }
 0x1a0   :  { %843 = vsyncpa [#allocation3], 1 }
 0x1a1   :  { %845 = vsyncpa [#allocation3 + $0x1], 1 }
 0x1a2   :  { %846 = vsyncpa [#allocation6], 1 }
 0x1a3   :  { %848 = vsyncpa [#allocation6 + $0x1], 1 }
 0x1a4   :  { %849 = vsyncpa [#allocation4], 1 }
 0x1a5   :  { %851 = vsyncpa [#allocation4 + $0x1], 1 }

</bundles_post_ra>
